<compile_context>
chip_gen: v5e
topology: v5e:2x2
jax: 0.10.0
libtpu: 0.0.40
codegen_flags: <defaults>
</compile_context>

<pallas_src>
import functools

import jax
import jax.numpy as jnp
from jax.experimental import pallas as pl
from jax.experimental.pallas import tpu as pltpu

_EPS = 1e-5


def _round_up(a, b):
    return -(-a // b) * b


def _vmem_params():
    """Generation-aware (budget_bytes, vmem_limit_bytes)."""
    try:
        cap = int(pltpu.get_tpu_info().vmem_capacity_bytes)
    except Exception:  # not queryable -> assume the smallest part (v7x: 64 MiB)
        cap = 64 << 20
    if cap <= (64 << 20):          # v7x-class TensorCore
        return 12 << 20, 32 << 20
    return 16 << 20, 32 << 20      # v5e / v6e (128 MiB physical)


def _layernorm_kernel(x_ref, gamma_ref, beta_ref, o_ref):
    """Plain LayerNorm: one row per sublane, full-width feature block."""
    x = x_ref[...].astype(jnp.float32)                       # (TR, D)
    d_inv = jnp.float32(1.0 / x.shape[-1])
    mean = jnp.sum(x, axis=-1, keepdims=True) * d_inv        # (TR, 1)
    xc = x - mean
    var = jnp.sum(xc * xc, axis=-1, keepdims=True) * d_inv   # two-pass, torch-accurate
    inv = jax.lax.rsqrt(var + _EPS)
    o_ref[...] = (xc * inv * gamma_ref[...] + beta_ref[...]).astype(o_ref.dtype)


def _layernorm_folded_kernel(x_ref, gamma_ref, beta_ref, o_ref, *, k, d):
    """LayerNorm with k rows folded into the lane axis: block is (TR, k*d), k*d % 128 == 0.

    Each length-d lane segment is an independent row; I/O is lane-dense so stores
    are unmasked.  Per-segment reductions use static lane slices (exact f32, VPU/XLU).
    """
    x = x_ref[...].astype(jnp.float32)                       # (TR, k*d)
    d_inv = jnp.float32(1.0 / d)
    pieces = []
    for i in range(k):                                       # small static unroll (k <= 16)
        xi = x[:, i * d:(i + 1) * d]                         # (TR, d)
        mean = jnp.sum(xi, axis=-1, keepdims=True) * d_inv
        xc = xi - mean
        var = jnp.sum(xc * xc, axis=-1, keepdims=True) * d_inv
        pieces.append(xc * jax.lax.rsqrt(var + _EPS))
    y = jnp.concatenate(pieces, axis=-1)                     # (TR, k*d)
    o_ref[...] = (y * gamma_ref[...] + beta_ref[...]).astype(o_ref.dtype)


def _run(kernel, x2, gamma2, beta2, d_feat):
    rows, width = x2.shape
    itemsize = jnp.dtype(x2.dtype).itemsize
    sublane = max(8, 32 // itemsize)          # 8 f32 / 16 bf16 / 32 int8-fp8

    vmem_budget, vmem_limit = _vmem_params()

    # Real per-row VMEM footprint: VMEM pads the lane dim to 128, double-buffered
    # input + output blocks, plus ~3 full-width f32 temporaries (x, x-mean, y).
    # TODO(synk): for sub-32-bit inputs, chunk the reduction over the lane axis so
    # the full-width f32 copy is never materialized and the tile can grow again.
    width_pad = _round_up(width, 128)
    per_row_bytes = 4 * width_pad * itemsize + 3 * width_pad * 4

    tr = max(sublane, vmem_budget // per_row_bytes)
    tr = max(sublane, (tr // sublane) * sublane)

    # Prefer >= ~8 grid steps (>= 4 per TC on v7x) for pipelining, with a ~256-row
    # tile floor (bandwidth already saturates at that block size).
    if rows > 256:
        tr = min(tr, max(256, _round_up(-(-rows // 8), sublane)))
    if tr >= rows:
        tr = rows                              # single full-extent block (always legal)

    # Ragged last block: padded rows hold stale/garbage data but are never written
    # back, and rows are independent, so this is safe (no jnp.pad -> no extra HBM pass).
    grid = (pl.cdiv(rows, tr),)

    cost = pl.CostEstimate(
        flops=8 * rows * width,
        transcendentals=rows * (width // d_feat),
        bytes_accessed=2 * rows * width * itemsize + 2 * width * 4,
    )

    return pl.pallas_call(
        kernel,
        out_shape=jax.ShapeDtypeStruct((rows, width), x2.dtype),
        grid_spec=pltpu.PrefetchScalarGridSpec(
            num_scalar_prefetch=0,
            grid=grid,
            in_specs=[
                pl.BlockSpec((tr, width), lambda i: (i, 0)),
                pl.BlockSpec((1, width), lambda i: (0, 0)),   # gamma: VMEM-resident
                pl.BlockSpec((1, width), lambda i: (0, 0)),   # beta:  VMEM-resident
            ],
            out_specs=pl.BlockSpec((tr, width), lambda i: (i, 0)),
        ),
        compiler_params=pltpu.CompilerParams(
            dimension_semantics=("parallel",),
            vmem_limit_bytes=vmem_limit,
        ),
        cost_estimate=cost,
    )(x2, gamma2, beta2)


def layer_norm(x, gamma, beta):
    """LayerNorm over the last dim of x with per-feature gamma/beta (eps=1e-5)."""
    orig_shape = x.shape
    D = orig_shape[-1]
    rows = 1
    for s in orig_shape[:-1]:
        rows *= s
    x2 = x.reshape(rows, D)
    gamma_f32 = gamma.reshape(-1).astype(jnp.float32)
    beta_f32 = beta.reshape(-1).astype(jnp.float32)

    # Lane folding for narrow features: pack k = 128 // D rows into the lane axis so
    # the output BlockSpec is lane-dense (unmasked stores).
    k = 128 // D if (0 < D < 128 and 128 % D == 0) else 1
    if k > 1 and D >= 8 and rows > 0 and rows % k == 0:
        width = k * D
        x2f = x2.reshape(rows // k, width)                 # contiguous -> free reshape
        gamma2 = jnp.tile(gamma_f32, k).reshape(1, width)
        beta2 = jnp.tile(beta_f32, k).reshape(1, width)
        kernel = functools.partial(_layernorm_folded_kernel, k=k, d=D)
        out = _run(kernel, x2f, gamma2, beta2, D)
        return out.reshape(orig_shape)

    # TODO(synk): D < 128 with rows % k != 0 (or D not dividing 128) still takes the
    # masked-partial-store path; a remainder-block variant would make it lane-dense too.
    out = _run(_layernorm_kernel, x2, gamma_f32.reshape(1, D), beta_f32.reshape(1, D), D)
    return out.reshape(orig_shape)


class LayerNorm:
    """JAX/Pallas port of the PyTorch LayerNorm module (gamma learnable ones, beta buffer zeros)."""

    def __init__(self, dim):
        self.gamma = jnp.ones((dim,), dtype=jnp.float32)
        self.beta = jnp.zeros((dim,), dtype=jnp.float32)

    def __call__(self, x):
        return layer_norm(x, self.gamma, self.beta)


if __name__ == "__main__":
    key = jax.random.PRNGKey(0)
    B, N, D = 2, 8, 32
    x = jax.random.normal(key, (B, N, D), dtype=jnp.float32)

    ln = LayerNorm(D)
    y = jax.block_until_ready(ln(x))     # rows=16, k=4 -> lane-folded path

    mean = jnp.mean(x, axis=-1, keepdims=True)
    var = jnp.mean((x - mean) ** 2, axis=-1, keepdims=True)
    ref = (x - mean) / jnp.sqrt(var + 1e-5) * ln.gamma + ln.beta
    assert y.shape == x.shape and y.dtype == x.dtype
    assert jnp.allclose(y, ref, atol=1e-5, rtol=1e-5)

    # Row count not divisible by the fold factor -> exercises the plain
    # (full-dim block / masked-store fallback) path.
    x_odd = jax.random.normal(jax.random.PRNGKey(1), (3, 7, D), dtype=jnp.float32)
    y_odd = jax.block_until_ready(ln(x_odd))
    m2 = jnp.mean(x_odd, axis=-1, keepdims=True)
    v2 = jnp.mean((x_odd - m2) ** 2, axis=-1, keepdims=True)
    ref2 = (x_odd - m2) / jnp.sqrt(v2 + 1e-5) * ln.gamma + ln.beta
    assert jnp.allclose(y_odd, ref2, atol=1e-5, rtol=1e-5)

    print("KERNEL_OK")
</pallas_src>

<mosaic_0001>
module attributes {stable_mosaic.version = 11 : i64} {
  func.func @_layernorm_folded_kernel(%arg0: i32, %arg1: memref<4x128xf32, #tpu.memory_space<vmem>>, %arg2: memref<1x128xf32, #tpu.memory_space<vmem>>, %arg3: memref<1x128xf32, #tpu.memory_space<vmem>>, %arg4: memref<4x128xf32, #tpu.memory_space<vmem>>) attributes {dimension_semantics = [#tpu.dimension_semantics<parallel>], iteration_bounds = array<i64: 1>, scalar_prefetch = 0 : i64, scratch_operands = 0 : i64, tpu.core_type = #tpu.core_type<tc>, window_params = [{transform_indices = @transform_0, window_bounds = array<i64: 4, 128>}, {pipeline_mode = #tpu.pipeline_mode<synchronous>, transform_indices = @transform_1, window_bounds = array<i64: 1, 128>}, {pipeline_mode = #tpu.pipeline_mode<synchronous>, transform_indices = @transform_2, window_bounds = array<i64: 1, 128>}, {transform_indices = @transform_3, window_bounds = array<i64: 4, 128>}]} {
    %c0 = arith.constant 0 : index
    %c0_0 = arith.constant 0 : index
    %0 = vector.load %arg1[%c0, %c0_0] : memref<4x128xf32, #tpu.memory_space<vmem>>, vector<4x128xf32>
    %1 = vector.extract_strided_slice %0 {offsets = [0, 0], sizes = [4, 32], strides = [1, 1]} : vector<4x128xf32> to vector<4x32xf32>
    %cst = arith.constant dense<0.000000e+00> : vector<4xf32>
    %2 = vector.multi_reduction <add>, %1, %cst [1] : vector<4x32xf32> to vector<4xf32>
    %3 = vector.shape_cast %2 : vector<4xf32> to vector<4x1xf32>
    %cst_1 = arith.constant 3.125000e-02 : f32
    %4 = vector.broadcast %cst_1 : f32 to vector<4x1xf32>
    %5 = arith.mulf %3, %4 : vector<4x1xf32>
    %6 = vector.broadcast %5 : vector<4x1xf32> to vector<4x32xf32>
    %7 = arith.subf %1, %6 : vector<4x32xf32>
    %8 = arith.mulf %7, %7 : vector<4x32xf32>
    %cst_2 = arith.constant dense<0.000000e+00> : vector<4xf32>
    %9 = vector.multi_reduction <add>, %8, %cst_2 [1] : vector<4x32xf32> to vector<4xf32>
    %10 = vector.shape_cast %9 : vector<4xf32> to vector<4x1xf32>
    %cst_3 = arith.constant 3.125000e-02 : f32
    %11 = vector.broadcast %cst_3 : f32 to vector<4x1xf32>
    %12 = arith.mulf %10, %11 : vector<4x1xf32>
    %cst_4 = arith.constant 9.99999974E-6 : f32
    %13 = vector.broadcast %cst_4 : f32 to vector<4x1xf32>
    %14 = arith.addf %12, %13 : vector<4x1xf32>
    %15 = math.rsqrt %14 : vector<4x1xf32>
    %16 = vector.broadcast %15 : vector<4x1xf32> to vector<4x32xf32>
    %17 = arith.mulf %7, %16 : vector<4x32xf32>
    %18 = vector.extract_strided_slice %0 {offsets = [0, 32], sizes = [4, 32], strides = [1, 1]} : vector<4x128xf32> to vector<4x32xf32>
    %cst_5 = arith.constant dense<0.000000e+00> : vector<4xf32>
    %19 = vector.multi_reduction <add>, %18, %cst_5 [1] : vector<4x32xf32> to vector<4xf32>
    %20 = vector.shape_cast %19 : vector<4xf32> to vector<4x1xf32>
    %cst_6 = arith.constant 3.125000e-02 : f32
    %21 = vector.broadcast %cst_6 : f32 to vector<4x1xf32>
    %22 = arith.mulf %20, %21 : vector<4x1xf32>
    %23 = vector.broadcast %22 : vector<4x1xf32> to vector<4x32xf32>
    %24 = arith.subf %18, %23 : vector<4x32xf32>
    %25 = arith.mulf %24, %24 : vector<4x32xf32>
    %cst_7 = arith.constant dense<0.000000e+00> : vector<4xf32>
    %26 = vector.multi_reduction <add>, %25, %cst_7 [1] : vector<4x32xf32> to vector<4xf32>
    %27 = vector.shape_cast %26 : vector<4xf32> to vector<4x1xf32>
    %cst_8 = arith.constant 3.125000e-02 : f32
    %28 = vector.broadcast %cst_8 : f32 to vector<4x1xf32>
    %29 = arith.mulf %27, %28 : vector<4x1xf32>
    %cst_9 = arith.constant 9.99999974E-6 : f32
    %30 = vector.broadcast %cst_9 : f32 to vector<4x1xf32>
    %31 = arith.addf %29, %30 : vector<4x1xf32>
    %32 = math.rsqrt %31 : vector<4x1xf32>
    %33 = vector.broadcast %32 : vector<4x1xf32> to vector<4x32xf32>
    %34 = arith.mulf %24, %33 : vector<4x32xf32>
    %35 = vector.extract_strided_slice %0 {offsets = [0, 64], sizes = [4, 32], strides = [1, 1]} : vector<4x128xf32> to vector<4x32xf32>
    %cst_10 = arith.constant dense<0.000000e+00> : vector<4xf32>
    %36 = vector.multi_reduction <add>, %35, %cst_10 [1] : vector<4x32xf32> to vector<4xf32>
    %37 = vector.shape_cast %36 : vector<4xf32> to vector<4x1xf32>
    %cst_11 = arith.constant 3.125000e-02 : f32
    %38 = vector.broadcast %cst_11 : f32 to vector<4x1xf32>
    %39 = arith.mulf %37, %38 : vector<4x1xf32>
    %40 = vector.broadcast %39 : vector<4x1xf32> to vector<4x32xf32>
    %41 = arith.subf %35, %40 : vector<4x32xf32>
    %42 = arith.mulf %41, %41 : vector<4x32xf32>
    %cst_12 = arith.constant dense<0.000000e+00> : vector<4xf32>
    %43 = vector.multi_reduction <add>, %42, %cst_12 [1] : vector<4x32xf32> to vector<4xf32>
    %44 = vector.shape_cast %43 : vector<4xf32> to vector<4x1xf32>
    %cst_13 = arith.constant 3.125000e-02 : f32
    %45 = vector.broadcast %cst_13 : f32 to vector<4x1xf32>
    %46 = arith.mulf %44, %45 : vector<4x1xf32>
    %cst_14 = arith.constant 9.99999974E-6 : f32
    %47 = vector.broadcast %cst_14 : f32 to vector<4x1xf32>
    %48 = arith.addf %46, %47 : vector<4x1xf32>
    %49 = math.rsqrt %48 : vector<4x1xf32>
    %50 = vector.broadcast %49 : vector<4x1xf32> to vector<4x32xf32>
    %51 = arith.mulf %41, %50 : vector<4x32xf32>
    %52 = vector.extract_strided_slice %0 {offsets = [0, 96], sizes = [4, 32], strides = [1, 1]} : vector<4x128xf32> to vector<4x32xf32>
    %cst_15 = arith.constant dense<0.000000e+00> : vector<4xf32>
    %53 = vector.multi_reduction <add>, %52, %cst_15 [1] : vector<4x32xf32> to vector<4xf32>
    %54 = vector.shape_cast %53 : vector<4xf32> to vector<4x1xf32>
    %cst_16 = arith.constant 3.125000e-02 : f32
    %55 = vector.broadcast %cst_16 : f32 to vector<4x1xf32>
    %56 = arith.mulf %54, %55 : vector<4x1xf32>
    %57 = vector.broadcast %56 : vector<4x1xf32> to vector<4x32xf32>
    %58 = arith.subf %52, %57 : vector<4x32xf32>
    %59 = arith.mulf %58, %58 : vector<4x32xf32>
    %cst_17 = arith.constant dense<0.000000e+00> : vector<4xf32>
    %60 = vector.multi_reduction <add>, %59, %cst_17 [1] : vector<4x32xf32> to vector<4xf32>
    %61 = vector.shape_cast %60 : vector<4xf32> to vector<4x1xf32>
    %cst_18 = arith.constant 3.125000e-02 : f32
    %62 = vector.broadcast %cst_18 : f32 to vector<4x1xf32>
    %63 = arith.mulf %61, %62 : vector<4x1xf32>
    %cst_19 = arith.constant 9.99999974E-6 : f32
    %64 = vector.broadcast %cst_19 : f32 to vector<4x1xf32>
    %65 = arith.addf %63, %64 : vector<4x1xf32>
    %66 = math.rsqrt %65 : vector<4x1xf32>
    %67 = vector.broadcast %66 : vector<4x1xf32> to vector<4x32xf32>
    %68 = arith.mulf %58, %67 : vector<4x32xf32>
    %69 = tpu.concatenate %17, %34, %51, %68 in 1 : vector<4x32xf32>, vector<4x32xf32>, vector<4x32xf32>, vector<4x32xf32> -> vector<4x128xf32>
    %c0_20 = arith.constant 0 : index
    %c0_21 = arith.constant 0 : index
    %70 = vector.load %arg2[%c0_20, %c0_21] : memref<1x128xf32, #tpu.memory_space<vmem>>, vector<1x128xf32>
    %71 = vector.broadcast %70 : vector<1x128xf32> to vector<4x128xf32>
    %72 = arith.mulf %69, %71 : vector<4x128xf32>
    %c0_22 = arith.constant 0 : index
    %c0_23 = arith.constant 0 : index
    %73 = vector.load %arg3[%c0_22, %c0_23] : memref<1x128xf32, #tpu.memory_space<vmem>>, vector<1x128xf32>
    %74 = vector.broadcast %73 : vector<1x128xf32> to vector<4x128xf32>
    %75 = arith.addf %72, %74 : vector<4x128xf32>
    %c0_24 = arith.constant 0 : index
    %c0_25 = arith.constant 0 : index
    %76 = vector.load %arg4[%c0_24, %c0_25] : memref<4x128xf32, #tpu.memory_space<vmem>>, vector<4x128xf32>
    tpu.vector_store %arg4[%c0_24, %c0_25], %75 {strides = array<i32>} : memref<4x128xf32, #tpu.memory_space<vmem>>, vector<4x128xf32>,
    return
  }
  func.func @transform_0(%arg0: i32) -> (i32, i32) {
    %c0_i32 = arith.constant 0 : i32
    %c0_i32_0 = arith.constant 0 : i32
    return %arg0, %c0_i32 : i32, i32
  }
  func.func @transform_1(%arg0: i32) -> (i32, i32) {
    %c0_i32 = arith.constant 0 : i32
    %c0_i32_0 = arith.constant 0 : i32
    %c0_i32_1 = arith.constant 0 : i32
    return %c0_i32, %c0_i32_0 : i32, i32
  }
  func.func @transform_2(%arg0: i32) -> (i32, i32) {
    %c0_i32 = arith.constant 0 : i32
    %c0_i32_0 = arith.constant 0 : i32
    %c0_i32_1 = arith.constant 0 : i32
    return %c0_i32, %c0_i32_0 : i32, i32
  }
  func.func @transform_3(%arg0: i32) -> (i32, i32) {
    %c0_i32 = arith.constant 0 : i32
    %c0_i32_0 = arith.constant 0 : i32
    return %arg0, %c0_i32 : i32, i32
  }
}

</mosaic_0001>

<bundles_post_ra>
// kernel: tpu_custom_call.1
= control target key start
LH: loop header
LB: loop body
LE: loop exit
PB: predicated region body
PF: predicated region fallthrough
CT: control target
= control target key end

     0   :  { %8 = vsyncpa [#allocation3], 0  ;;  %s358_s0 = inlined_call_operand.hbm [shape: f32[4,128], index: 0, kind: input, shape index: {}]   ;;  %s359_s1 = inlined_call_operand.hbm [shape: f32[1,128], index: 1, kind: input, shape index: {}]   ;;  %s360_s2 = inlined_call_operand.vmem [shape: f32[1,128], index: 2, kind: input, shape index: {}]   ;;  %s361_s3 = inlined_call_operand.hbm [shape: f32[4,128], index: 3, kind: output, shape index: {}]  }
   0x1   :  { %9 = vsyncpa [#allocation6], 0 }
   0x2   :  { %10 = vsyncpa [#allocation4], 0  ;;  %s16_s14 = sshll.u32 %s358_s0, 4  ;;  %s284_s15 = smov [#allocation2]   ;;  %s17_s14 = int_to_ptr.hbm [resolvable:$true] %s16_s14 }
   0x3   :  { %s18_s16 = sshll.u32 %s284_s15, 4  ;;  %s27_s19 = sshll.u32 %s359_s1, 4  ;;  %s19_s16 = int_to_ptr.vmem [resolvable:$true] %s18_s16  ;;  %s28_s19 = int_to_ptr.hbm [resolvable:$true] %s27_s19 }
   0x4   :  { %21 = dma.hbm_to_vmem [thread:$0]  %s17_s14, 64, %s19_s16, [#allocation3]  }
   0x5   :  { %s285_s20 = smov [#allocation5]  }
   0x6   :  { %s29_s21 = sshll.u32 %s285_s20, 4  ;;  %s30_s21 = int_to_ptr.vmem [resolvable:$true] %s29_s21 }
   0x7   :  { %32 = dma.hbm_to_vmem [thread:$0]  %s28_s19, 16, %s30_s21, [#allocation6]  }
   0x8   :  { %278 = dma.done.wait [#allocation3], 64  }
   0x9   :  { %279 = vsyncadd [#allocation3], 4294967232 }
   0xa   :  { %280 = dma.done.wait [#allocation6], 16  }
   0xb   :  { %281 = vsyncadd [#allocation6], 4294967280  ;;  %v43_v0 = vld [vmem:[#allocation2] sm:$0xf]  ;;  %s286_s0 = smov 96   ;;  %s287_s22 = smov 32  }
   0xc   :  { %68 = vrot.lane.b32.xlu0 %v43_v0, %s286_s0  ;;  %126 = vrot.lane.b32.xlu1 %v43_v0, %s287_s22  ;;  %s288_s23 = smov 64   ;;  %vm44_vm0 = vcmask 257024   ;;  %vm155_vm12 = vcmask 261120   ;;  %vm157_vm14 = vcmask 523264   ;;  %vm159_vm15 = vcmask 785408   ;;  %s289_s25 = smov [#allocation7]  }
   0xd   :  { %v45_v1 = vsel %vm44_vm0, %v43_v0, 0.0  ;;  %s177_s26 = sshll.u32 %s289_s25, 4  ;;  %s179_s29 = sshll.u32 %s361_s3, 4  ;;  %s178_s26 = int_to_ptr.vmem [resolvable:$true] %s177_s26  ;;  %s180_s29 = int_to_ptr.hbm [resolvable:$true] %s179_s29 }
  0x14   :  { %97 = vrot.lane.b32.xlu0 %v43_v0, %s288_s23 }
  0x3e   :  { %46 = vadd.xlane.f32.xlu0 %v45_v1 }
  0x7e   :  { %v69_v2 = vpop.permute.xlu0 %68  ;;  %v127_v6 = vpop.permute.xlu1 %126 }
  0x7f   :  { %v71_v3 = vsel %vm44_vm0, %v69_v2, 0.0  ;;  %v129_v7 = vsel %vm44_vm0, %v127_v6, 0.0 }
  0x80   :  { %72 = vadd.xlane.f32.xlu1 %v71_v3 }
  0x86   :  { %v98_v4 = vpop.permute.xlu0 %97 }
  0x87   :  { %v100_v5 = vsel %vm44_vm0, %v98_v4, 0.0 }
  0x88   :  { %101 = vadd.xlane.f32.xlu2 %v100_v5 }
  0x90   :  { %130 = vadd.xlane.f32.xlu2 %v129_v7 }
  0xb1   :  { %v47_v8 = vpop.xlane.xlu0 %46 }
  0xb2   :  { %v48_v9 = vmul.f32 0.03125, %v47_v8 }
  0xb4   :  { %v321_v10 = vsub.f32 %v43_v0, %v48_v9 }
  0xb6   :  { %v50_v11 = vmul.f32 %v321_v10, %v321_v10 }
  0xb8   :  { %v51_v12 = vsel %vm44_vm0, %v50_v11, 0.0 }
  0xb9   :  { %52 = vadd.xlane.f32.xlu1 %v51_v12  ;;  %v196_v12 = vld [vmem:[#allocation5] ss:$0 sm:$0xff] }
  0xf3   :  { %v73_v13 = vpop.xlane.xlu1 %72 }
  0xf4   :  { %v74_v14 = vmul.f32 0.03125, %v73_v13 }
  0xf6   :  { %v326_v15 = vsub.f32 %v43_v0, %v74_v14 }
  0xf8   :  { %v76_v16 = vmul.f32 %v326_v15, %v326_v15 }
  0xfa   :  { %78 = vrot.lane.b32.xlu2 %v76_v16, %s286_s0 }
  0xfb   :  { %v102_v17 = vpop.xlane.xlu2 %101 }
  0xfc   :  { %v103_v18 = vmul.f32 0.03125, %v102_v17 }
  0xfe   :  { %v330_v19 = vsub.f32 %v43_v0, %v103_v18 }
 0x100   :  { %v105_v20 = vmul.f32 %v330_v19, %v330_v19 }
 0x102   :  { %107 = vrot.lane.b32.xlu2 %v105_v20, %s288_s23 }
 0x103   :  { %v131_v21 = vpop.xlane.xlu2 %130 }
 0x104   :  { %v132_v22 = vmul.f32 0.03125, %v131_v21 }
 0x106   :  { %v334_v23 = vsub.f32 %v43_v0, %v132_v22 }
 0x108   :  { %v134_v24 = vmul.f32 %v334_v23, %v334_v23 }
 0x10a   :  { %136 = vrot.lane.b32.xlu2 %v134_v24, %s287_s22 }
 0x12c   :  { %v53_v31 = vpop.xlane.xlu1 %52 }
 0x12d   :  { %v54_v32 = vmul.f32 0.03125, %v53_v31 }
 0x12f   :  { %v55_v33 = vadd.f32 1e-05, %v54_v32 }
 0x131   :  { %198 = vrsqrt.f32 %v55_v33  ;;  %vm62_vm1 = vweird.f32 %v55_v33 }
 0x137   :  { %v199_v39 = vpop.eup %198 }
 0x138   :  { %v57_v43 = vmul.f32 %v199_v39, %v55_v33  ;;  %vm63_vm2 = vweird.f32 %v199_v39 }
 0x139   :  { %vm342_vm5 = vmor %vm62_vm1, %vm63_vm2 }
 0x13a   :  { %v58_v47 = vmul.f32 %v199_v39, %v57_v43 }
 0x13c   :  { %v59_v52 = vmul.f32 0.5, %v58_v47 }
 0x13e   :  { %v60_v56 = vsub.f32 1.5, %v59_v52 }
 0x140   :  { %v61_v62 = vmul.f32 %v199_v39, %v60_v56 }
 0x142   :  { %v65_v4 = vsel %vm342_vm5, %v199_v39, %v61_v62 }
 0x143   :  { %v66_v9 = vmul.f32 %v65_v4, %v321_v10 }
 0x154   :  { %v79_v25 = vpop.permute.xlu2 %78 }
 0x155   :  { %v81_v26 = vsel %vm44_vm0, %v79_v25, 0.0 }
 0x156   :  { %82 = vadd.xlane.f32.xlu2 %v81_v26 }
 0x15c   :  { %v108_v27 = vpop.permute.xlu2 %107 }
 0x15d   :  { %v110_v28 = vsel %vm44_vm0, %v108_v27, 0.0 }
 0x15e   :  { %111 = vadd.xlane.f32.xlu0 %v110_v28 }
 0x164   :  { %v137_v29 = vpop.permute.xlu2 %136 }
 0x165   :  { %v139_v30 = vsel %vm44_vm0, %v137_v29, 0.0 }
 0x166   :  { %140 = vadd.xlane.f32.xlu1 %v139_v30 }
 0x1c9   :  { %v83_v34 = vpop.xlane.xlu2 %82 }
 0x1ca   :  { %v84_v35 = vmul.f32 0.03125, %v83_v34 }
 0x1cc   :  { %v85_v36 = vadd.f32 1e-05, %v84_v35 }
 0x1ce   :  { %200 = vrsqrt.f32 %v85_v36  ;;  %vm92_vm6 = vweird.f32 %v85_v36 }
 0x1d1   :  { %v112_v37 = vpop.xlane.xlu0 %111 }
 0x1d2   :  { %v113_v38 = vmul.f32 0.03125, %v112_v37 }
 0x1d4   :  { %v201_v40 = vpop.eup %200  ;;  %v114_v41 = vadd.f32 1e-05, %v113_v38 }
 0x1d5   :  { %v87_v42 = vmul.f32 %v201_v40, %v85_v36  ;;  %vm93_vm3 = vweird.f32 %v201_v40 }
 0x1d6   :  { %202 = vrsqrt.f32 %v114_v41  ;;  %vm94_vm7 = vmor %vm92_vm6, %vm93_vm3  ;;  %vm121_vm8 = vweird.f32 %v114_v41 }
 0x1d7   :  { %v88_v44 = vmul.f32 %v201_v40, %v87_v42 }
 0x1d9   :  { %v141_v45 = vpop.xlane.xlu1 %140  ;;  %v89_v50 = vmul.f32 0.5, %v88_v44 }
 0x1da   :  { %v142_v46 = vmul.f32 0.03125, %v141_v45 }
 0x1db   :  { %v90_v54 = vsub.f32 1.5, %v89_v50 }
 0x1dc   :  { %v203_v48 = vpop.eup %202  ;;  %v143_v49 = vadd.f32 1e-05, %v142_v46 }
 0x1dd   :  { %v116_v51 = vmul.f32 %v203_v48, %v114_v41  ;;  %v91_v59 = vmul.f32 %v201_v40, %v90_v54  ;;  %vm122_vm4 = vweird.f32 %v203_v48 }
 0x1de   :  { %204 = vrsqrt.f32 %v143_v49  ;;  %vm123_vm9 = vmor %vm121_vm8, %vm122_vm4  ;;  %vm150_vm11 = vweird.f32 %v143_v49 }
 0x1df   :  { %v117_v53 = vmul.f32 %v203_v48, %v116_v51  ;;  %v95_v1 = vsel %vm94_vm7, %v201_v40, %v91_v59 }
 0x1e0   :  { %v96_v6 = vmul.f32 %v95_v1, %v326_v15  ;;  %v197_v15 = vld [vmem:[%s360_s2] ss:$0 sm:$0xff] }
 0x1e1   :  { %v118_v55 = vmul.f32 0.5, %v117_v53 }
 0x1e2   :  { %v156_v14 = vsel %vm155_vm12, %v66_v9, %v96_v6 }
 0x1e3   :  { %v119_v57 = vsub.f32 1.5, %v118_v55 }
 0x1e4   :  { %v205_v58 = vpop.eup %204 }
 0x1e5   :  { %v145_v60 = vmul.f32 %v205_v58, %v143_v49  ;;  %v120_v61 = vmul.f32 %v203_v48, %v119_v57  ;;  %vm151_vm10 = vweird.f32 %v205_v58 }
 0x1e6   :  { %vm152_vm13 = vmor %vm150_vm11, %vm151_vm10 }
 0x1e7   :  { %v146_v0 = vmul.f32 %v205_v58, %v145_v60  ;;  %v124_v3 = vsel %vm123_vm9, %v203_v48, %v120_v61 }
 0x1e8   :  { %v125_v7 = vmul.f32 %v124_v3, %v330_v19 }
 0x1e9   :  { %v147_v2 = vmul.f32 0.5, %v146_v0 }
 0x1ea   :  { %v158_v16 = vsel %vm157_vm14, %v156_v14, %v125_v7 }
 0x1eb   :  { %v148_v5 = vsub.f32 1.5, %v147_v2 }
 0x1ed   :  { %v149_v8 = vmul.f32 %v205_v58, %v148_v5 }
 0x1ef   :  { %v153_v11 = vsel %vm152_vm13, %v205_v58, %v149_v8 }
 0x1f0   :  { %v154_v13 = vmul.f32 %v153_v11, %v334_v23 }
 0x1f2   :  { %v160_v17 = vsel %vm159_vm15, %v158_v16, %v154_v13 }
 0x1f3   :  { %v165_v10 = vmul.f32 %v196_v12, %v160_v17 }
 0x1f5   :  { %v170_v18 = vadd.f32 %v197_v15, %v165_v10 }
 0x1f7   :  { %171 = vst [vmem:[#allocation7] sm:$0xf] %v170_v18 }
 0x1f8   :  { %182 = dma.vmem_to_hbm [thread:$0]  %s178_s26, 64, %s180_s29, [#allocation4]  }
 0x1f9   :  { %282 = dma.done.wait [#allocation4], 64  }
 0x1fa   :  { %283 = vsyncadd [#allocation4], 4294967232 }
 0x1fb   :  { %187 = vsyncpa [#allocation3], 1 }
 0x1fc   :  { %188 = vsyncpa [#allocation6], 1 }
 0x1fd   :  { %189 = vsyncpa [#allocation4], 1 }

</bundles_post_ra>
